<compile_context>
chip_gen: v5e
topology: v5e:2x2
jax: 0.10.0
libtpu: 0.0.40
codegen_flags: <defaults>
</compile_context>

<pallas_src>
import jax
import jax.numpy as jnp
from jax.experimental import pallas as pl
from jax.experimental.pallas import tpu as pltpu


def _round_up(x: int, m: int) -> int:
    return (x + m - 1) // m * m


def crf_loglik_kernel(em_ref, tags_ref, mask_ref, start_ref, end_ref,
                      transT_ref, expTT_ref, out_ref):
    # em_ref:    (S, T, BB) f32   emissions, batch on lanes
    # tags_ref:  (S, BB)     i32
    # mask_ref:  (S, BB)     f32 {0,1}
    # start_ref: (T, 1)      f32
    # end_ref:   (T, 1)      f32
    # transT_ref:(T, T)      f32   trans.T          (transT[j,i] = trans[i,j])
    # expTT_ref: (T, T)      f32   exp(trans-max).T
    S, T, BB = em_ref.shape
    f32 = jnp.float32

    start = start_ref[...]                       # (T, 1)
    end = end_ref[...]                           # (T, 1)
    transT = transT_ref[...]                     # (T, T)
    expTT = expTT_ref[...]                       # (T, T)
    tmax = jnp.max(transT)                       # == max(trans), exact

    iota_t = jax.lax.broadcasted_iota(jnp.int32, (T, BB), 0)

    def one_hot(tag_row):                        # (1, BB) i32 -> (T, BB) f32
        return (iota_t == tag_row).astype(f32)

    em0 = em_ref[0]                              # (T, BB)
    tag0 = tags_ref[pl.ds(0, 1), :]              # (1, BB)
    mask0 = mask_ref[pl.ds(0, 1), :]             # (1, BB)
    oh0 = one_hot(tag0)

    alpha0 = start + em0                         # (T, BB)
    score0 = (jnp.sum(start * oh0, axis=0, keepdims=True)
              + jnp.sum(em0 * oh0, axis=0, keepdims=True) * mask0)

    def body(i, carry):
        alpha, score, oh_prev, last_oh = carry
        em_i = em_ref[i]                                   # (T, BB)
        mask_i = mask_ref[pl.ds(i, 1), :]                  # (1, BB)
        tag_i = tags_ref[pl.ds(i, 1), :]                   # (1, BB)
        oh_i = one_hot(tag_i)                              # (T, BB)

        # ---- numerator (fused, O(T*BB) intermediates only) ----
        emit_i = jnp.sum(em_i * oh_i, axis=0, keepdims=True)
        # trans[tag_{i-1}, j] for every lane: (T,T) @ (T,BB) on the MXU
        trow = jnp.dot(transT, oh_prev, preferred_element_type=f32)
        tr_i = jnp.sum(trow * oh_i, axis=0, keepdims=True)
        score = score + (emit_i + tr_i) * mask_i

        # ---- denominator: forward recursion in prob space (MXU) ----
        m = jnp.max(alpha, axis=0, keepdims=True)          # (1, BB)
        p = jnp.exp(alpha - m)                             # (T, BB)
        s = jnp.dot(expTT, p, preferred_element_type=f32)  # (T, BB)
        lse = jnp.log(s) + m + tmax + em_i                 # (T, BB)
        alpha = jnp.where(mask_i > 0.0, lse, alpha)

        last_oh = jnp.where(mask_i > 0.0, oh_i, last_oh)
        return (alpha, score, oh_i, last_oh)

    if S <= 32 and T <= 16:
        unroll = True
    elif T <= 32:
        unroll = 4
    else:
        unroll = 2
    alpha, score, _, last_oh = jax.lax.fori_loop(
        1, S, body, (alpha0, score0, oh0, oh0), unroll=unroll)

    numerator = score + jnp.sum(end * last_oh, axis=0, keepdims=True)  # (1,BB)

    stops = alpha + end                                    # (T, BB)
    mx = jnp.max(stops, axis=0, keepdims=True)             # (1, BB)
    denominator = mx + jnp.log(
        jnp.sum(jnp.exp(stops - mx), axis=0, keepdims=True))           # (1,BB)

    # padded batch lanes have mask[0] == 0 -> excluded from the block sum
    out_ref[...] = jnp.reshape(
        jnp.sum((numerator - denominator) * mask0), (1, 1, 1))


def crf_forward(emissions, tags, mask, start_transitions, end_transitions,
                transitions, batch_first=False, block_b=None):
    """Returns scalar log-likelihood sum over the batch (reduction='sum')."""
    if batch_first:
        emissions = jnp.transpose(emissions, (1, 0, 2))
        tags = jnp.transpose(tags, (1, 0))
        mask = jnp.transpose(mask, (1, 0))
    S, B, T = emissions.shape
    f32 = jnp.float32

    # batch-on-lanes layout
    em_t = jnp.transpose(emissions.astype(f32), (0, 2, 1))   # (S, T, B)
    tags_i = tags.astype(jnp.int32)                           # (S, B)
    mask_f = mask.astype(f32)                                 # (S, B)

    if B <= 128:
        # single block covering the true (unpadded) batch; nb == 1
        block_b = B
        Bp = B
    else:
        block_b = 128 if block_b is None else _round_up(block_b, 128)
        Bp = _round_up(B, block_b)
    nb = Bp // block_b
    if Bp != B:
        em_t = jnp.pad(em_t, ((0, 0), (0, 0), (0, Bp - B)))
        tags_i = jnp.pad(tags_i, ((0, 0), (0, Bp - B)))
        mask_f = jnp.pad(mask_f, ((0, 0), (0, Bp - B)))

    start_col = start_transitions.astype(f32).reshape(T, 1)
    end_col = end_transitions.astype(f32).reshape(T, 1)
    trans_f = transitions.astype(f32)
    transT = trans_f.T
    tmax = jnp.max(trans_f)
    expTT = jnp.exp(trans_f - tmax).T        # stabilized; kernel adds tmax back

    # VMEM budget from the real tiled footprint (inputs x2 buffers + live regs)
    Tt = _round_up(T, 8)
    Bt = _round_up(block_b, 128)
    Ss = _round_up(S, 8)
    em_blk = S * Tt * Bt * 4
    sm_blk = 2 * Ss * Bt * 4
    par_blk = (2 * Tt * Tt + 2 * Tt * 128) * 4
    live = 12 * Tt * Bt * 4
    vmem_req = 2 * (em_blk + sm_blk + par_blk) + live + (2 << 20)
    vmem_limit = int(min(max(vmem_req, 16 << 20), 48 << 20))

    out = pl.pallas_call(
        crf_loglik_kernel,
        out_shape=jax.ShapeDtypeStruct((nb, 1, 1), f32),
        grid=(nb,),
        in_specs=[
            pl.BlockSpec((S, T, block_b), lambda b: (0, 0, b)),   # emissions
            pl.BlockSpec((S, block_b), lambda b: (0, b)),         # tags
            pl.BlockSpec((S, block_b), lambda b: (0, b)),         # mask
            pl.BlockSpec((T, 1), lambda b: (0, 0)),               # start
            pl.BlockSpec((T, 1), lambda b: (0, 0)),               # end
            pl.BlockSpec((T, T), lambda b: (0, 0)),               # trans.T
            pl.BlockSpec((T, T), lambda b: (0, 0)),               # exp(trans).T
        ],
        out_specs=pl.BlockSpec((1, 1, 1), lambda b: (b, 0, 0)),
        compiler_params=pltpu.CompilerParams(
            dimension_semantics=("parallel",),
            vmem_limit_bytes=vmem_limit),
    )(em_t, tags_i, mask_f, start_col, end_col, transT, expTT)
    # TODO(synk): for very long sequences, additionally tile the S axis (grid
    # over S tiles with alpha/score/oh_prev carried in VMEM scratch) so the
    # whole (S, T, block_b) emissions block need not be VMEM-resident.
    return jnp.sum(out)


def crf_forward_ref(emissions, tags, mask, start, end, trans):
    """Pure-JAX reference mirroring the PyTorch module (batch_first=False)."""
    S, B, T = emissions.shape
    maskf = mask.astype(jnp.float32)

    # numerator
    score = start[tags[0]]
    for i in range(S - 1):
        cur, nxt = tags[i], tags[i + 1]
        trans_score = trans[cur, nxt]
        emit_score = emissions[i][jnp.arange(B), cur]
        score = score + trans_score * maskf[i + 1] + emit_score * maskf[i]
    last_idx = (jnp.sum(maskf, axis=0) - 1).astype(jnp.int32)
    last_tags = tags[last_idx, jnp.arange(B)]
    score = (score + end[last_tags]
             + emissions[S - 1][jnp.arange(B), last_tags] * maskf[S - 1])

    # denominator
    alpha = start[None, :] + emissions[0]
    for i in range(1, S):
        inner = alpha[:, :, None] + emissions[i][:, None, :] + trans[None, :, :]
        lse = jax.scipy.special.logsumexp(inner, axis=1)
        alpha = lse * maskf[i][:, None] + alpha * (1.0 - maskf[i][:, None])
    denom = jax.scipy.special.logsumexp(alpha + end[None, :], axis=-1)
    return jnp.sum(score - denom)


if __name__ == "__main__":
    num_tags = 8
    seq_len = 8
    batch = 4

    key = jax.random.PRNGKey(0)
    k_em, k_tags, k_trans, k_start, k_end = jax.random.split(key, 5)

    # Deterministic parameter init mirroring reset_parameters():
    #   transitions ~ xavier_normal (std = sqrt(2/(fan_in+fan_out)))
    #   start/end   ~ standard normal
    xavier_std = (2.0 / (num_tags + num_tags)) ** 0.5
    transitions = xavier_std * jax.random.normal(
        k_trans, (num_tags, num_tags), jnp.float32)
    start_transitions = jax.random.normal(k_start, (num_tags,), jnp.float32)
    end_transitions = jax.random.normal(k_end, (num_tags,), jnp.float32)

    # Inputs (time-major, batch_first=False)
    emissions = jax.random.normal(k_em, (seq_len, batch, num_tags), jnp.float32)
    tags = jax.random.randint(k_tags, (seq_len, batch), 0, num_tags, jnp.int32)
    lengths = jnp.array([8, 6, 8, 5], dtype=jnp.int32)
    mask = (jnp.arange(seq_len)[:, None] < lengths[None, :])  # (S, B) bool

    out = crf_forward(emissions, tags, mask, start_transitions,
                      end_transitions, transitions, batch_first=False)
    out = jax.block_until_ready(out)

    ref = crf_forward_ref(emissions, tags, mask, start_transitions,
                          end_transitions, transitions)
    assert jnp.allclose(out, ref, rtol=1e-3, atol=1e-3), (out, ref)

    print("KERNEL_OK")
</pallas_src>

<mosaic_0001>
module attributes {stable_mosaic.version = 11 : i64} {
  func.func @crf_loglik_kernel(%arg0: i32, %arg1: memref<8x8x4xf32, #tpu.memory_space<vmem>>, %arg2: memref<8x4xi32, #tpu.memory_space<vmem>>, %arg3: memref<8x4xf32, #tpu.memory_space<vmem>>, %arg4: memref<8x1xf32, #tpu.memory_space<vmem>>, %arg5: memref<8x1xf32, #tpu.memory_space<vmem>>, %arg6: memref<8x8xf32, #tpu.memory_space<vmem>>, %arg7: memref<8x8xf32, #tpu.memory_space<vmem>>, %arg8: memref<1x1x1xf32, #tpu.memory_space<vmem>>) attributes {dimension_semantics = [#tpu.dimension_semantics<parallel>], iteration_bounds = array<i64: 1>, scalar_prefetch = 0 : i64, scratch_operands = 0 : i64, tpu.core_type = #tpu.core_type<tc>, window_params = [{transform_indices = @transform_0, window_bounds = array<i64: 8, 8, 4>}, {transform_indices = @transform_1, window_bounds = array<i64: 8, 4>}, {transform_indices = @transform_2, window_bounds = array<i64: 8, 4>}, {pipeline_mode = #tpu.pipeline_mode<synchronous>, transform_indices = @transform_3, window_bounds = array<i64: 8, 1>}, {pipeline_mode = #tpu.pipeline_mode<synchronous>, transform_indices = @transform_4, window_bounds = array<i64: 8, 1>}, {pipeline_mode = #tpu.pipeline_mode<synchronous>, transform_indices = @transform_5, window_bounds = array<i64: 8, 8>}, {pipeline_mode = #tpu.pipeline_mode<synchronous>, transform_indices = @transform_6, window_bounds = array<i64: 8, 8>}, {transform_indices = @transform_7, window_bounds = array<i64: 1, 1, 1>}]} {
    %c0 = arith.constant 0 : index
    %c0_0 = arith.constant 0 : index
    %0 = vector.load %arg4[%c0, %c0_0] : memref<8x1xf32, #tpu.memory_space<vmem>>, vector<8x1xf32>
    %c0_1 = arith.constant 0 : index
    %c0_2 = arith.constant 0 : index
    %1 = vector.load %arg5[%c0_1, %c0_2] : memref<8x1xf32, #tpu.memory_space<vmem>>, vector<8x1xf32>
    %c0_3 = arith.constant 0 : index
    %c0_4 = arith.constant 0 : index
    %2 = vector.load %arg6[%c0_3, %c0_4] : memref<8x8xf32, #tpu.memory_space<vmem>>, vector<8x8xf32>
    %c0_5 = arith.constant 0 : index
    %c0_6 = arith.constant 0 : index
    %3 = vector.load %arg7[%c0_5, %c0_6] : memref<8x8xf32, #tpu.memory_space<vmem>>, vector<8x8xf32>
    %4 = vector.shape_cast %2 : vector<8x8xf32> to vector<1x8x8xf32>
    %cst = arith.constant dense<0xFF800000> : vector<1xf32>
    %5 = vector.multi_reduction <maximumf>, %4, %cst [1, 2] : vector<1x8x8xf32> to vector<1xf32>
    %6 = vector.shape_cast %5 : vector<1xf32> to vector<1x1x1xf32>
    %7 = vector.extract %6[0, 0, 0] : f32 from vector<1x1x1xf32>
    %8 = tpu.iota {dimensions = array<i32: 0>} : vector<8x4xi32>
    %c0_7 = arith.constant 0 : index
    %c0_8 = arith.constant 0 : index
    %c0_9 = arith.constant 0 : index
    %9 = vector.load %arg1[%c0_7, %c0_8, %c0_9] : memref<8x8x4xf32, #tpu.memory_space<vmem>>, vector<1x8x4xf32>
    %10 = vector.shape_cast %9 : vector<1x8x4xf32> to vector<8x4xf32>
    %c0_10 = arith.constant 0 : index
    %c0_11 = arith.constant 0 : index
    %11 = vector.load %arg2[%c0_10, %c0_11] : memref<8x4xi32, #tpu.memory_space<vmem>>, vector<1x4xi32>
    %c0_12 = arith.constant 0 : index
    %c0_13 = arith.constant 0 : index
    %12 = vector.load %arg3[%c0_12, %c0_13] : memref<8x4xf32, #tpu.memory_space<vmem>>, vector<1x4xf32>
    %13 = vector.broadcast %11 : vector<1x4xi32> to vector<8x4xi32>
    %14 = arith.cmpi eq, %8, %13 : vector<8x4xi32>
    %15 = arith.extui %14 : vector<8x4xi1> to vector<8x4xi32>
    %16 = arith.sitofp %15 : vector<8x4xi32> to vector<8x4xf32>
    %17 = vector.broadcast %0 : vector<8x1xf32> to vector<8x4xf32>
    %18 = arith.addf %17, %10 : vector<8x4xf32>
    %19 = vector.broadcast %0 : vector<8x1xf32> to vector<8x4xf32>
    %20 = arith.mulf %19, %16 : vector<8x4xf32>
    %cst_14 = arith.constant dense<0.000000e+00> : vector<4xf32>
    %21 = vector.multi_reduction <add>, %20, %cst_14 [0] : vector<8x4xf32> to vector<4xf32>
    %22 = vector.shape_cast %21 : vector<4xf32> to vector<1x4xf32>
    %23 = arith.mulf %10, %16 : vector<8x4xf32>
    %cst_15 = arith.constant dense<0.000000e+00> : vector<4xf32>
    %24 = vector.multi_reduction <add>, %23, %cst_15 [0] : vector<8x4xf32> to vector<4xf32>
    %25 = vector.shape_cast %24 : vector<4xf32> to vector<1x4xf32>
    %26 = arith.mulf %25, %12 : vector<1x4xf32>
    %27 = arith.addf %22, %26 : vector<1x4xf32>
    %c1_i32 = arith.constant 1 : i32
    %28 = arith.index_cast %c1_i32 : i32 to index
    %c0_16 = arith.constant 0 : index
    %c0_17 = arith.constant 0 : index
    %29 = vector.load %arg1[%28, %c0_16, %c0_17] : memref<8x8x4xf32, #tpu.memory_space<vmem>>, vector<1x8x4xf32>
    %30 = vector.shape_cast %29 : vector<1x8x4xf32> to vector<8x4xf32>
    %31 = arith.index_cast %c1_i32 : i32 to index
    %c0_18 = arith.constant 0 : index
    %32 = vector.load %arg3[%31, %c0_18] : memref<8x4xf32, #tpu.memory_space<vmem>>, vector<1x4xf32>
    %33 = arith.index_cast %c1_i32 : i32 to index
    %c0_19 = arith.constant 0 : index
    %34 = vector.load %arg2[%33, %c0_19] : memref<8x4xi32, #tpu.memory_space<vmem>>, vector<1x4xi32>
    %35 = vector.broadcast %34 : vector<1x4xi32> to vector<8x4xi32>
    %36 = arith.cmpi eq, %8, %35 : vector<8x4xi32>
    %37 = arith.extui %36 : vector<8x4xi1> to vector<8x4xi32>
    %38 = arith.sitofp %37 : vector<8x4xi32> to vector<8x4xf32>
    %39 = arith.mulf %30, %38 : vector<8x4xf32>
    %cst_20 = arith.constant dense<0.000000e+00> : vector<4xf32>
    %40 = vector.multi_reduction <add>, %39, %cst_20 [0] : vector<8x4xf32> to vector<4xf32>
    %41 = vector.shape_cast %40 : vector<4xf32> to vector<1x4xf32>
    %cst_21 = arith.constant dense<0.000000e+00> : vector<8x4xf32>
    %42 = tpu.matmul %2, %16, %cst_21 {dimension_numbers = #tpu.dot_dimension_numbers<[1], [0], [0], [1], [0, 0, 1, 1], [], []>} : vector<8x8xf32>, vector<8x4xf32>, vector<8x4xf32> -> vector<8x4xf32>
    %43 = arith.mulf %42, %38 : vector<8x4xf32>
    %cst_22 = arith.constant dense<0.000000e+00> : vector<4xf32>
    %44 = vector.multi_reduction <add>, %43, %cst_22 [0] : vector<8x4xf32> to vector<4xf32>
    %45 = vector.shape_cast %44 : vector<4xf32> to vector<1x4xf32>
    %46 = arith.addf %41, %45 : vector<1x4xf32>
    %47 = arith.mulf %46, %32 : vector<1x4xf32>
    %48 = arith.addf %27, %47 : vector<1x4xf32>
    %cst_23 = arith.constant dense<0xFF800000> : vector<4xf32>
    %49 = vector.multi_reduction <maximumf>, %18, %cst_23 [0] : vector<8x4xf32> to vector<4xf32>
    %50 = vector.shape_cast %49 : vector<4xf32> to vector<1x4xf32>
    %51 = vector.broadcast %50 : vector<1x4xf32> to vector<8x4xf32>
    %52 = arith.subf %18, %51 : vector<8x4xf32>
    %53 = math.exp %52 : vector<8x4xf32>
    %cst_24 = arith.constant dense<0.000000e+00> : vector<8x4xf32>
    %54 = tpu.matmul %3, %53, %cst_24 {dimension_numbers = #tpu.dot_dimension_numbers<[1], [0], [0], [1], [0, 0, 1, 1], [], []>} : vector<8x8xf32>, vector<8x4xf32>, vector<8x4xf32> -> vector<8x4xf32>
    %55 = math.log %54 : vector<8x4xf32>
    %56 = vector.broadcast %50 : vector<1x4xf32> to vector<8x4xf32>
    %57 = arith.addf %55, %56 : vector<8x4xf32>
    %58 = vector.broadcast %7 : f32 to vector<8x4xf32>
    %59 = arith.addf %57, %58 : vector<8x4xf32>
    %60 = arith.addf %59, %30 : vector<8x4xf32>
    %cst_25 = arith.constant 0.000000e+00 : f32
    %61 = vector.broadcast %cst_25 : f32 to vector<1x4xf32>
    %62 = arith.cmpf ogt, %32, %61 : vector<1x4xf32>
    %63 = vector.shape_cast %62 : vector<1x4xi1> to vector<1x4xi1>
    %64 = vector.broadcast %63 : vector<1x4xi1> to vector<8x4xi1>
    %65 = arith.select %64, %60, %18 : vector<8x4xi1>, vector<8x4xf32>
    %cst_26 = arith.constant 0.000000e+00 : f32
    %66 = vector.broadcast %cst_26 : f32 to vector<1x4xf32>
    %67 = arith.cmpf ogt, %32, %66 : vector<1x4xf32>
    %68 = vector.shape_cast %67 : vector<1x4xi1> to vector<1x4xi1>
    %69 = vector.broadcast %68 : vector<1x4xi1> to vector<8x4xi1>
    %70 = arith.select %69, %38, %16 : vector<8x4xi1>, vector<8x4xf32>
    %c2_i32 = arith.constant 2 : i32
    %71 = arith.index_cast %c2_i32 : i32 to index
    %c0_27 = arith.constant 0 : index
    %c0_28 = arith.constant 0 : index
    %72 = vector.load %arg1[%71, %c0_27, %c0_28] : memref<8x8x4xf32, #tpu.memory_space<vmem>>, vector<1x8x4xf32>
    %73 = vector.shape_cast %72 : vector<1x8x4xf32> to vector<8x4xf32>
    %74 = arith.index_cast %c2_i32 : i32 to index
    %c0_29 = arith.constant 0 : index
    %75 = vector.load %arg3[%74, %c0_29] : memref<8x4xf32, #tpu.memory_space<vmem>>, vector<1x4xf32>
    %76 = arith.index_cast %c2_i32 : i32 to index
    %c0_30 = arith.constant 0 : index
    %77 = vector.load %arg2[%76, %c0_30] : memref<8x4xi32, #tpu.memory_space<vmem>>, vector<1x4xi32>
    %78 = vector.broadcast %77 : vector<1x4xi32> to vector<8x4xi32>
    %79 = arith.cmpi eq, %8, %78 : vector<8x4xi32>
    %80 = arith.extui %79 : vector<8x4xi1> to vector<8x4xi32>
    %81 = arith.sitofp %80 : vector<8x4xi32> to vector<8x4xf32>
    %82 = arith.mulf %73, %81 : vector<8x4xf32>
    %cst_31 = arith.constant dense<0.000000e+00> : vector<4xf32>
    %83 = vector.multi_reduction <add>, %82, %cst_31 [0] : vector<8x4xf32> to vector<4xf32>
    %84 = vector.shape_cast %83 : vector<4xf32> to vector<1x4xf32>
    %cst_32 = arith.constant dense<0.000000e+00> : vector<8x4xf32>
    %85 = tpu.matmul %2, %38, %cst_32 {dimension_numbers = #tpu.dot_dimension_numbers<[1], [0], [0], [1], [0, 0, 1, 1], [], []>} : vector<8x8xf32>, vector<8x4xf32>, vector<8x4xf32> -> vector<8x4xf32>
    %86 = arith.mulf %85, %81 : vector<8x4xf32>
    %cst_33 = arith.constant dense<0.000000e+00> : vector<4xf32>
    %87 = vector.multi_reduction <add>, %86, %cst_33 [0] : vector<8x4xf32> to vector<4xf32>
    %88 = vector.shape_cast %87 : vector<4xf32> to vector<1x4xf32>
    %89 = arith.addf %84, %88 : vector<1x4xf32>
    %90 = arith.mulf %89, %75 : vector<1x4xf32>
    %91 = arith.addf %48, %90 : vector<1x4xf32>
    %cst_34 = arith.constant dense<0xFF800000> : vector<4xf32>
    %92 = vector.multi_reduction <maximumf>, %65, %cst_34 [0] : vector<8x4xf32> to vector<4xf32>
    %93 = vector.shape_cast %92 : vector<4xf32> to vector<1x4xf32>
    %94 = vector.broadcast %93 : vector<1x4xf32> to vector<8x4xf32>
    %95 = arith.subf %65, %94 : vector<8x4xf32>
    %96 = math.exp %95 : vector<8x4xf32>
    %cst_35 = arith.constant dense<0.000000e+00> : vector<8x4xf32>
    %97 = tpu.matmul %3, %96, %cst_35 {dimension_numbers = #tpu.dot_dimension_numbers<[1], [0], [0], [1], [0, 0, 1, 1], [], []>} : vector<8x8xf32>, vector<8x4xf32>, vector<8x4xf32> -> vector<8x4xf32>
    %98 = math.log %97 : vector<8x4xf32>
    %99 = vector.broadcast %93 : vector<1x4xf32> to vector<8x4xf32>
    %100 = arith.addf %98, %99 : vector<8x4xf32>
    %101 = vector.broadcast %7 : f32 to vector<8x4xf32>
    %102 = arith.addf %100, %101 : vector<8x4xf32>
    %103 = arith.addf %102, %73 : vector<8x4xf32>
    %cst_36 = arith.constant 0.000000e+00 : f32
    %104 = vector.broadcast %cst_36 : f32 to vector<1x4xf32>
    %105 = arith.cmpf ogt, %75, %104 : vector<1x4xf32>
    %106 = vector.shape_cast %105 : vector<1x4xi1> to vector<1x4xi1>
    %107 = vector.broadcast %106 : vector<1x4xi1> to vector<8x4xi1>
    %108 = arith.select %107, %103, %65 : vector<8x4xi1>, vector<8x4xf32>
    %cst_37 = arith.constant 0.000000e+00 : f32
    %109 = vector.broadcast %cst_37 : f32 to vector<1x4xf32>
    %110 = arith.cmpf ogt, %75, %109 : vector<1x4xf32>
    %111 = vector.shape_cast %110 : vector<1x4xi1> to vector<1x4xi1>
    %112 = vector.broadcast %111 : vector<1x4xi1> to vector<8x4xi1>
    %113 = arith.select %112, %81, %70 : vector<8x4xi1>, vector<8x4xf32>
    %c3_i32 = arith.constant 3 : i32
    %114 = arith.index_cast %c3_i32 : i32 to index
    %c0_38 = arith.constant 0 : index
    %c0_39 = arith.constant 0 : index
    %115 = vector.load %arg1[%114, %c0_38, %c0_39] : memref<8x8x4xf32, #tpu.memory_space<vmem>>, vector<1x8x4xf32>
    %116 = vector.shape_cast %115 : vector<1x8x4xf32> to vector<8x4xf32>
    %117 = arith.index_cast %c3_i32 : i32 to index
    %c0_40 = arith.constant 0 : index
    %118 = vector.load %arg3[%117, %c0_40] : memref<8x4xf32, #tpu.memory_space<vmem>>, vector<1x4xf32>
    %119 = arith.index_cast %c3_i32 : i32 to index
    %c0_41 = arith.constant 0 : index
    %120 = vector.load %arg2[%119, %c0_41] : memref<8x4xi32, #tpu.memory_space<vmem>>, vector<1x4xi32>
    %121 = vector.broadcast %120 : vector<1x4xi32> to vector<8x4xi32>
    %122 = arith.cmpi eq, %8, %121 : vector<8x4xi32>
    %123 = arith.extui %122 : vector<8x4xi1> to vector<8x4xi32>
    %124 = arith.sitofp %123 : vector<8x4xi32> to vector<8x4xf32>
    %125 = arith.mulf %116, %124 : vector<8x4xf32>
    %cst_42 = arith.constant dense<0.000000e+00> : vector<4xf32>
    %126 = vector.multi_reduction <add>, %125, %cst_42 [0] : vector<8x4xf32> to vector<4xf32>
    %127 = vector.shape_cast %126 : vector<4xf32> to vector<1x4xf32>
    %cst_43 = arith.constant dense<0.000000e+00> : vector<8x4xf32>
    %128 = tpu.matmul %2, %81, %cst_43 {dimension_numbers = #tpu.dot_dimension_numbers<[1], [0], [0], [1], [0, 0, 1, 1], [], []>} : vector<8x8xf32>, vector<8x4xf32>, vector<8x4xf32> -> vector<8x4xf32>
    %129 = arith.mulf %128, %124 : vector<8x4xf32>
    %cst_44 = arith.constant dense<0.000000e+00> : vector<4xf32>
    %130 = vector.multi_reduction <add>, %129, %cst_44 [0] : vector<8x4xf32> to vector<4xf32>
    %131 = vector.shape_cast %130 : vector<4xf32> to vector<1x4xf32>
    %132 = arith.addf %127, %131 : vector<1x4xf32>
    %133 = arith.mulf %132, %118 : vector<1x4xf32>
    %134 = arith.addf %91, %133 : vector<1x4xf32>
    %cst_45 = arith.constant dense<0xFF800000> : vector<4xf32>
    %135 = vector.multi_reduction <maximumf>, %108, %cst_45 [0] : vector<8x4xf32> to vector<4xf32>
    %136 = vector.shape_cast %135 : vector<4xf32> to vector<1x4xf32>
    %137 = vector.broadcast %136 : vector<1x4xf32> to vector<8x4xf32>
    %138 = arith.subf %108, %137 : vector<8x4xf32>
    %139 = math.exp %138 : vector<8x4xf32>
    %cst_46 = arith.constant dense<0.000000e+00> : vector<8x4xf32>
    %140 = tpu.matmul %3, %139, %cst_46 {dimension_numbers = #tpu.dot_dimension_numbers<[1], [0], [0], [1], [0, 0, 1, 1], [], []>} : vector<8x8xf32>, vector<8x4xf32>, vector<8x4xf32> -> vector<8x4xf32>
    %141 = math.log %140 : vector<8x4xf32>
    %142 = vector.broadcast %136 : vector<1x4xf32> to vector<8x4xf32>
    %143 = arith.addf %141, %142 : vector<8x4xf32>
    %144 = vector.broadcast %7 : f32 to vector<8x4xf32>
    %145 = arith.addf %143, %144 : vector<8x4xf32>
    %146 = arith.addf %145, %116 : vector<8x4xf32>
    %cst_47 = arith.constant 0.000000e+00 : f32
    %147 = vector.broadcast %cst_47 : f32 to vector<1x4xf32>
    %148 = arith.cmpf ogt, %118, %147 : vector<1x4xf32>
    %149 = vector.shape_cast %148 : vector<1x4xi1> to vector<1x4xi1>
    %150 = vector.broadcast %149 : vector<1x4xi1> to vector<8x4xi1>
    %151 = arith.select %150, %146, %108 : vector<8x4xi1>, vector<8x4xf32>
    %cst_48 = arith.constant 0.000000e+00 : f32
    %152 = vector.broadcast %cst_48 : f32 to vector<1x4xf32>
    %153 = arith.cmpf ogt, %118, %152 : vector<1x4xf32>
    %154 = vector.shape_cast %153 : vector<1x4xi1> to vector<1x4xi1>
    %155 = vector.broadcast %154 : vector<1x4xi1> to vector<8x4xi1>
    %156 = arith.select %155, %124, %113 : vector<8x4xi1>, vector<8x4xf32>
    %c4_i32 = arith.constant 4 : i32
    %157 = arith.index_cast %c4_i32 : i32 to index
    %c0_49 = arith.constant 0 : index
    %c0_50 = arith.constant 0 : index
    %158 = vector.load %arg1[%157, %c0_49, %c0_50] : memref<8x8x4xf32, #tpu.memory_space<vmem>>, vector<1x8x4xf32>
    %159 = vector.shape_cast %158 : vector<1x8x4xf32> to vector<8x4xf32>
    %160 = arith.index_cast %c4_i32 : i32 to index
    %c0_51 = arith.constant 0 : index
    %161 = vector.load %arg3[%160, %c0_51] : memref<8x4xf32, #tpu.memory_space<vmem>>, vector<1x4xf32>
    %162 = arith.index_cast %c4_i32 : i32 to index
    %c0_52 = arith.constant 0 : index
    %163 = vector.load %arg2[%162, %c0_52] : memref<8x4xi32, #tpu.memory_space<vmem>>, vector<1x4xi32>
    %164 = vector.broadcast %163 : vector<1x4xi32> to vector<8x4xi32>
    %165 = arith.cmpi eq, %8, %164 : vector<8x4xi32>
    %166 = arith.extui %165 : vector<8x4xi1> to vector<8x4xi32>
    %167 = arith.sitofp %166 : vector<8x4xi32> to vector<8x4xf32>
    %168 = arith.mulf %159, %167 : vector<8x4xf32>
    %cst_53 = arith.constant dense<0.000000e+00> : vector<4xf32>
    %169 = vector.multi_reduction <add>, %168, %cst_53 [0] : vector<8x4xf32> to vector<4xf32>
    %170 = vector.shape_cast %169 : vector<4xf32> to vector<1x4xf32>
    %cst_54 = arith.constant dense<0.000000e+00> : vector<8x4xf32>
    %171 = tpu.matmul %2, %124, %cst_54 {dimension_numbers = #tpu.dot_dimension_numbers<[1], [0], [0], [1], [0, 0, 1, 1], [], []>} : vector<8x8xf32>, vector<8x4xf32>, vector<8x4xf32> -> vector<8x4xf32>
    %172 = arith.mulf %171, %167 : vector<8x4xf32>
    %cst_55 = arith.constant dense<0.000000e+00> : vector<4xf32>
    %173 = vector.multi_reduction <add>, %172, %cst_55 [0] : vector<8x4xf32> to vector<4xf32>
    %174 = vector.shape_cast %173 : vector<4xf32> to vector<1x4xf32>
    %175 = arith.addf %170, %174 : vector<1x4xf32>
    %176 = arith.mulf %175, %161 : vector<1x4xf32>
    %177 = arith.addf %134, %176 : vector<1x4xf32>
    %cst_56 = arith.constant dense<0xFF800000> : vector<4xf32>
    %178 = vector.multi_reduction <maximumf>, %151, %cst_56 [0] : vector<8x4xf32> to vector<4xf32>
    %179 = vector.shape_cast %178 : vector<4xf32> to vector<1x4xf32>
    %180 = vector.broadcast %179 : vector<1x4xf32> to vector<8x4xf32>
    %181 = arith.subf %151, %180 : vector<8x4xf32>
    %182 = math.exp %181 : vector<8x4xf32>
    %cst_57 = arith.constant dense<0.000000e+00> : vector<8x4xf32>
    %183 = tpu.matmul %3, %182, %cst_57 {dimension_numbers = #tpu.dot_dimension_numbers<[1], [0], [0], [1], [0, 0, 1, 1], [], []>} : vector<8x8xf32>, vector<8x4xf32>, vector<8x4xf32> -> vector<8x4xf32>
    %184 = math.log %183 : vector<8x4xf32>
    %185 = vector.broadcast %179 : vector<1x4xf32> to vector<8x4xf32>
    %186 = arith.addf %184, %185 : vector<8x4xf32>
    %187 = vector.broadcast %7 : f32 to vector<8x4xf32>
    %188 = arith.addf %186, %187 : vector<8x4xf32>
    %189 = arith.addf %188, %159 : vector<8x4xf32>
    %cst_58 = arith.constant 0.000000e+00 : f32
    %190 = vector.broadcast %cst_58 : f32 to vector<1x4xf32>
    %191 = arith.cmpf ogt, %161, %190 : vector<1x4xf32>
    %192 = vector.shape_cast %191 : vector<1x4xi1> to vector<1x4xi1>
    %193 = vector.broadcast %192 : vector<1x4xi1> to vector<8x4xi1>
    %194 = arith.select %193, %189, %151 : vector<8x4xi1>, vector<8x4xf32>
    %cst_59 = arith.constant 0.000000e+00 : f32
    %195 = vector.broadcast %cst_59 : f32 to vector<1x4xf32>
    %196 = arith.cmpf ogt, %161, %195 : vector<1x4xf32>
    %197 = vector.shape_cast %196 : vector<1x4xi1> to vector<1x4xi1>
    %198 = vector.broadcast %197 : vector<1x4xi1> to vector<8x4xi1>
    %199 = arith.select %198, %167, %156 : vector<8x4xi1>, vector<8x4xf32>
    %c5_i32 = arith.constant 5 : i32
    %200 = arith.index_cast %c5_i32 : i32 to index
    %c0_60 = arith.constant 0 : index
    %c0_61 = arith.constant 0 : index
    %201 = vector.load %arg1[%200, %c0_60, %c0_61] : memref<8x8x4xf32, #tpu.memory_space<vmem>>, vector<1x8x4xf32>
    %202 = vector.shape_cast %201 : vector<1x8x4xf32> to vector<8x4xf32>
    %203 = arith.index_cast %c5_i32 : i32 to index
    %c0_62 = arith.constant 0 : index
    %204 = vector.load %arg3[%203, %c0_62] : memref<8x4xf32, #tpu.memory_space<vmem>>, vector<1x4xf32>
    %205 = arith.index_cast %c5_i32 : i32 to index
    %c0_63 = arith.constant 0 : index
    %206 = vector.load %arg2[%205, %c0_63] : memref<8x4xi32, #tpu.memory_space<vmem>>, vector<1x4xi32>
    %207 = vector.broadcast %206 : vector<1x4xi32> to vector<8x4xi32>
    %208 = arith.cmpi eq, %8, %207 : vector<8x4xi32>
    %209 = arith.extui %208 : vector<8x4xi1> to vector<8x4xi32>
    %210 = arith.sitofp %209 : vector<8x4xi32> to vector<8x4xf32>
    %211 = arith.mulf %202, %210 : vector<8x4xf32>
    %cst_64 = arith.constant dense<0.000000e+00> : vector<4xf32>
    %212 = vector.multi_reduction <add>, %211, %cst_64 [0] : vector<8x4xf32> to vector<4xf32>
    %213 = vector.shape_cast %212 : vector<4xf32> to vector<1x4xf32>
    %cst_65 = arith.constant dense<0.000000e+00> : vector<8x4xf32>
    %214 = tpu.matmul %2, %167, %cst_65 {dimension_numbers = #tpu.dot_dimension_numbers<[1], [0], [0], [1], [0, 0, 1, 1], [], []>} : vector<8x8xf32>, vector<8x4xf32>, vector<8x4xf32> -> vector<8x4xf32>
    %215 = arith.mulf %214, %210 : vector<8x4xf32>
    %cst_66 = arith.constant dense<0.000000e+00> : vector<4xf32>
    %216 = vector.multi_reduction <add>, %215, %cst_66 [0] : vector<8x4xf32> to vector<4xf32>
    %217 = vector.shape_cast %216 : vector<4xf32> to vector<1x4xf32>
    %218 = arith.addf %213, %217 : vector<1x4xf32>
    %219 = arith.mulf %218, %204 : vector<1x4xf32>
    %220 = arith.addf %177, %219 : vector<1x4xf32>
    %cst_67 = arith.constant dense<0xFF800000> : vector<4xf32>
    %221 = vector.multi_reduction <maximumf>, %194, %cst_67 [0] : vector<8x4xf32> to vector<4xf32>
    %222 = vector.shape_cast %221 : vector<4xf32> to vector<1x4xf32>
    %223 = vector.broadcast %222 : vector<1x4xf32> to vector<8x4xf32>
    %224 = arith.subf %194, %223 : vector<8x4xf32>
    %225 = math.exp %224 : vector<8x4xf32>
    %cst_68 = arith.constant dense<0.000000e+00> : vector<8x4xf32>
    %226 = tpu.matmul %3, %225, %cst_68 {dimension_numbers = #tpu.dot_dimension_numbers<[1], [0], [0], [1], [0, 0, 1, 1], [], []>} : vector<8x8xf32>, vector<8x4xf32>, vector<8x4xf32> -> vector<8x4xf32>
    %227 = math.log %226 : vector<8x4xf32>
    %228 = vector.broadcast %222 : vector<1x4xf32> to vector<8x4xf32>
    %229 = arith.addf %227, %228 : vector<8x4xf32>
    %230 = vector.broadcast %7 : f32 to vector<8x4xf32>
    %231 = arith.addf %229, %230 : vector<8x4xf32>
    %232 = arith.addf %231, %202 : vector<8x4xf32>
    %cst_69 = arith.constant 0.000000e+00 : f32
    %233 = vector.broadcast %cst_69 : f32 to vector<1x4xf32>
    %234 = arith.cmpf ogt, %204, %233 : vector<1x4xf32>
    %235 = vector.shape_cast %234 : vector<1x4xi1> to vector<1x4xi1>
    %236 = vector.broadcast %235 : vector<1x4xi1> to vector<8x4xi1>
    %237 = arith.select %236, %232, %194 : vector<8x4xi1>, vector<8x4xf32>
    %cst_70 = arith.constant 0.000000e+00 : f32
    %238 = vector.broadcast %cst_70 : f32 to vector<1x4xf32>
    %239 = arith.cmpf ogt, %204, %238 : vector<1x4xf32>
    %240 = vector.shape_cast %239 : vector<1x4xi1> to vector<1x4xi1>
    %241 = vector.broadcast %240 : vector<1x4xi1> to vector<8x4xi1>
    %242 = arith.select %241, %210, %199 : vector<8x4xi1>, vector<8x4xf32>
    %c6_i32 = arith.constant 6 : i32
    %243 = arith.index_cast %c6_i32 : i32 to index
    %c0_71 = arith.constant 0 : index
    %c0_72 = arith.constant 0 : index
    %244 = vector.load %arg1[%243, %c0_71, %c0_72] : memref<8x8x4xf32, #tpu.memory_space<vmem>>, vector<1x8x4xf32>
    %245 = vector.shape_cast %244 : vector<1x8x4xf32> to vector<8x4xf32>
    %246 = arith.index_cast %c6_i32 : i32 to index
    %c0_73 = arith.constant 0 : index
    %247 = vector.load %arg3[%246, %c0_73] : memref<8x4xf32, #tpu.memory_space<vmem>>, vector<1x4xf32>
    %248 = arith.index_cast %c6_i32 : i32 to index
    %c0_74 = arith.constant 0 : index
    %249 = vector.load %arg2[%248, %c0_74] : memref<8x4xi32, #tpu.memory_space<vmem>>, vector<1x4xi32>
    %250 = vector.broadcast %249 : vector<1x4xi32> to vector<8x4xi32>
    %251 = arith.cmpi eq, %8, %250 : vector<8x4xi32>
    %252 = arith.extui %251 : vector<8x4xi1> to vector<8x4xi32>
    %253 = arith.sitofp %252 : vector<8x4xi32> to vector<8x4xf32>
    %254 = arith.mulf %245, %253 : vector<8x4xf32>
    %cst_75 = arith.constant dense<0.000000e+00> : vector<4xf32>
    %255 = vector.multi_reduction <add>, %254, %cst_75 [0] : vector<8x4xf32> to vector<4xf32>
    %256 = vector.shape_cast %255 : vector<4xf32> to vector<1x4xf32>
    %cst_76 = arith.constant dense<0.000000e+00> : vector<8x4xf32>
    %257 = tpu.matmul %2, %210, %cst_76 {dimension_numbers = #tpu.dot_dimension_numbers<[1], [0], [0], [1], [0, 0, 1, 1], [], []>} : vector<8x8xf32>, vector<8x4xf32>, vector<8x4xf32> -> vector<8x4xf32>
    %258 = arith.mulf %257, %253 : vector<8x4xf32>
    %cst_77 = arith.constant dense<0.000000e+00> : vector<4xf32>
    %259 = vector.multi_reduction <add>, %258, %cst_77 [0] : vector<8x4xf32> to vector<4xf32>
    %260 = vector.shape_cast %259 : vector<4xf32> to vector<1x4xf32>
    %261 = arith.addf %256, %260 : vector<1x4xf32>
    %262 = arith.mulf %261, %247 : vector<1x4xf32>
    %263 = arith.addf %220, %262 : vector<1x4xf32>
    %cst_78 = arith.constant dense<0xFF800000> : vector<4xf32>
    %264 = vector.multi_reduction <maximumf>, %237, %cst_78 [0] : vector<8x4xf32> to vector<4xf32>
    %265 = vector.shape_cast %264 : vector<4xf32> to vector<1x4xf32>
    %266 = vector.broadcast %265 : vector<1x4xf32> to vector<8x4xf32>
    %267 = arith.subf %237, %266 : vector<8x4xf32>
    %268 = math.exp %267 : vector<8x4xf32>
    %cst_79 = arith.constant dense<0.000000e+00> : vector<8x4xf32>
    %269 = tpu.matmul %3, %268, %cst_79 {dimension_numbers = #tpu.dot_dimension_numbers<[1], [0], [0], [1], [0, 0, 1, 1], [], []>} : vector<8x8xf32>, vector<8x4xf32>, vector<8x4xf32> -> vector<8x4xf32>
    %270 = math.log %269 : vector<8x4xf32>
    %271 = vector.broadcast %265 : vector<1x4xf32> to vector<8x4xf32>
    %272 = arith.addf %270, %271 : vector<8x4xf32>
    %273 = vector.broadcast %7 : f32 to vector<8x4xf32>
    %274 = arith.addf %272, %273 : vector<8x4xf32>
    %275 = arith.addf %274, %245 : vector<8x4xf32>
    %cst_80 = arith.constant 0.000000e+00 : f32
    %276 = vector.broadcast %cst_80 : f32 to vector<1x4xf32>
    %277 = arith.cmpf ogt, %247, %276 : vector<1x4xf32>
    %278 = vector.shape_cast %277 : vector<1x4xi1> to vector<1x4xi1>
    %279 = vector.broadcast %278 : vector<1x4xi1> to vector<8x4xi1>
    %280 = arith.select %279, %275, %237 : vector<8x4xi1>, vector<8x4xf32>
    %cst_81 = arith.constant 0.000000e+00 : f32
    %281 = vector.broadcast %cst_81 : f32 to vector<1x4xf32>
    %282 = arith.cmpf ogt, %247, %281 : vector<1x4xf32>
    %283 = vector.shape_cast %282 : vector<1x4xi1> to vector<1x4xi1>
    %284 = vector.broadcast %283 : vector<1x4xi1> to vector<8x4xi1>
    %285 = arith.select %284, %253, %242 : vector<8x4xi1>, vector<8x4xf32>
    %c7_i32 = arith.constant 7 : i32
    %286 = arith.index_cast %c7_i32 : i32 to index
    %c0_82 = arith.constant 0 : index
    %c0_83 = arith.constant 0 : index
    %287 = vector.load %arg1[%286, %c0_82, %c0_83] : memref<8x8x4xf32, #tpu.memory_space<vmem>>, vector<1x8x4xf32>
    %288 = vector.shape_cast %287 : vector<1x8x4xf32> to vector<8x4xf32>
    %289 = arith.index_cast %c7_i32 : i32 to index
    %c0_84 = arith.constant 0 : index
    %290 = vector.load %arg3[%289, %c0_84] : memref<8x4xf32, #tpu.memory_space<vmem>>, vector<1x4xf32>
    %291 = arith.index_cast %c7_i32 : i32 to index
    %c0_85 = arith.constant 0 : index
    %292 = vector.load %arg2[%291, %c0_85] : memref<8x4xi32, #tpu.memory_space<vmem>>, vector<1x4xi32>
    %293 = vector.broadcast %292 : vector<1x4xi32> to vector<8x4xi32>
    %294 = arith.cmpi eq, %8, %293 : vector<8x4xi32>
    %295 = arith.extui %294 : vector<8x4xi1> to vector<8x4xi32>
    %296 = arith.sitofp %295 : vector<8x4xi32> to vector<8x4xf32>
    %297 = arith.mulf %288, %296 : vector<8x4xf32>
    %cst_86 = arith.constant dense<0.000000e+00> : vector<4xf32>
    %298 = vector.multi_reduction <add>, %297, %cst_86 [0] : vector<8x4xf32> to vector<4xf32>
    %299 = vector.shape_cast %298 : vector<4xf32> to vector<1x4xf32>
    %cst_87 = arith.constant dense<0.000000e+00> : vector<8x4xf32>
    %300 = tpu.matmul %2, %253, %cst_87 {dimension_numbers = #tpu.dot_dimension_numbers<[1], [0], [0], [1], [0, 0, 1, 1], [], []>} : vector<8x8xf32>, vector<8x4xf32>, vector<8x4xf32> -> vector<8x4xf32>
    %301 = arith.mulf %300, %296 : vector<8x4xf32>
    %cst_88 = arith.constant dense<0.000000e+00> : vector<4xf32>
    %302 = vector.multi_reduction <add>, %301, %cst_88 [0] : vector<8x4xf32> to vector<4xf32>
    %303 = vector.shape_cast %302 : vector<4xf32> to vector<1x4xf32>
    %304 = arith.addf %299, %303 : vector<1x4xf32>
    %305 = arith.mulf %304, %290 : vector<1x4xf32>
    %306 = arith.addf %263, %305 : vector<1x4xf32>
    %cst_89 = arith.constant dense<0xFF800000> : vector<4xf32>
    %307 = vector.multi_reduction <maximumf>, %280, %cst_89 [0] : vector<8x4xf32> to vector<4xf32>
    %308 = vector.shape_cast %307 : vector<4xf32> to vector<1x4xf32>
    %309 = vector.broadcast %308 : vector<1x4xf32> to vector<8x4xf32>
    %310 = arith.subf %280, %309 : vector<8x4xf32>
    %311 = math.exp %310 : vector<8x4xf32>
    %cst_90 = arith.constant dense<0.000000e+00> : vector<8x4xf32>
    %312 = tpu.matmul %3, %311, %cst_90 {dimension_numbers = #tpu.dot_dimension_numbers<[1], [0], [0], [1], [0, 0, 1, 1], [], []>} : vector<8x8xf32>, vector<8x4xf32>, vector<8x4xf32> -> vector<8x4xf32>
    %313 = math.log %312 : vector<8x4xf32>
    %314 = vector.broadcast %308 : vector<1x4xf32> to vector<8x4xf32>
    %315 = arith.addf %313, %314 : vector<8x4xf32>
    %316 = vector.broadcast %7 : f32 to vector<8x4xf32>
    %317 = arith.addf %315, %316 : vector<8x4xf32>
    %318 = arith.addf %317, %288 : vector<8x4xf32>
    %cst_91 = arith.constant 0.000000e+00 : f32
    %319 = vector.broadcast %cst_91 : f32 to vector<1x4xf32>
    %320 = arith.cmpf ogt, %290, %319 : vector<1x4xf32>
    %321 = vector.shape_cast %320 : vector<1x4xi1> to vector<1x4xi1>
    %322 = vector.broadcast %321 : vector<1x4xi1> to vector<8x4xi1>
    %323 = arith.select %322, %318, %280 : vector<8x4xi1>, vector<8x4xf32>
    %cst_92 = arith.constant 0.000000e+00 : f32
    %324 = vector.broadcast %cst_92 : f32 to vector<1x4xf32>
    %325 = arith.cmpf ogt, %290, %324 : vector<1x4xf32>
    %326 = vector.shape_cast %325 : vector<1x4xi1> to vector<1x4xi1>
    %327 = vector.broadcast %326 : vector<1x4xi1> to vector<8x4xi1>
    %328 = arith.select %327, %296, %285 : vector<8x4xi1>, vector<8x4xf32>
    %c7_i32_93 = arith.constant 7 : i32
    %329 = vector.broadcast %1 : vector<8x1xf32> to vector<8x4xf32>
    %330 = arith.mulf %329, %328 : vector<8x4xf32>
    %cst_94 = arith.constant dense<0.000000e+00> : vector<4xf32>
    %331 = vector.multi_reduction <add>, %330, %cst_94 [0] : vector<8x4xf32> to vector<4xf32>
    %332 = vector.shape_cast %331 : vector<4xf32> to vector<1x4xf32>
    %333 = arith.addf %306, %332 : vector<1x4xf32>
    %334 = vector.broadcast %1 : vector<8x1xf32> to vector<8x4xf32>
    %335 = arith.addf %323, %334 : vector<8x4xf32>
    %cst_95 = arith.constant dense<0xFF800000> : vector<4xf32>
    %336 = vector.multi_reduction <maximumf>, %335, %cst_95 [0] : vector<8x4xf32> to vector<4xf32>
    %337 = vector.shape_cast %336 : vector<4xf32> to vector<1x4xf32>
    %338 = vector.broadcast %337 : vector<1x4xf32> to vector<8x4xf32>
    %339 = arith.subf %335, %338 : vector<8x4xf32>
    %340 = math.exp %339 : vector<8x4xf32>
    %cst_96 = arith.constant dense<0.000000e+00> : vector<4xf32>
    %341 = vector.multi_reduction <add>, %340, %cst_96 [0] : vector<8x4xf32> to vector<4xf32>
    %342 = vector.shape_cast %341 : vector<4xf32> to vector<1x4xf32>
    %343 = math.log %342 : vector<1x4xf32>
    %344 = arith.addf %337, %343 : vector<1x4xf32>
    %345 = arith.subf %333, %344 : vector<1x4xf32>
    %346 = arith.mulf %345, %12 : vector<1x4xf32>
    %347 = vector.shape_cast %346 : vector<1x4xf32> to vector<1x1x4xf32>
    %cst_97 = arith.constant dense<0.000000e+00> : vector<1xf32>
    %348 = vector.multi_reduction <add>, %347, %cst_97 [1, 2] : vector<1x1x4xf32> to vector<1xf32>
    %349 = vector.shape_cast %348 : vector<1xf32> to vector<1x1x1xf32>
    %350 = vector.extract %349[0, 0, 0] : f32 from vector<1x1x1xf32>
    %351 = vector.broadcast %350 : f32 to vector<1x1x1xf32>
    %c0_98 = arith.constant 0 : index
    %c0_99 = arith.constant 0 : index
    %c0_100 = arith.constant 0 : index
    %352 = vector.load %arg8[%c0_98, %c0_99, %c0_100] : memref<1x1x1xf32, #tpu.memory_space<vmem>>, vector<1x1x1xf32>
    tpu.vector_store %arg8[%c0_98, %c0_99, %c0_100], %351 {strides = array<i32>} : memref<1x1x1xf32, #tpu.memory_space<vmem>>, vector<1x1x1xf32>,
    return
  }
  func.func @transform_0(%arg0: i32) -> (i32, i32, i32) {
    %c0_i32 = arith.constant 0 : i32
    %c0_i32_0 = arith.constant 0 : i32
    %c0_i32_1 = arith.constant 0 : i32
    return %c0_i32, %c0_i32_0, %arg0 : i32, i32, i32
  }
  func.func @transform_1(%arg0: i32) -> (i32, i32) {
    %c0_i32 = arith.constant 0 : i32
    %c0_i32_0 = arith.constant 0 : i32
    return %c0_i32, %arg0 : i32, i32
  }
  func.func @transform_2(%arg0: i32) -> (i32, i32) {
    %c0_i32 = arith.constant 0 : i32
    %c0_i32_0 = arith.constant 0 : i32
    return %c0_i32, %arg0 : i32, i32
  }
  func.func @transform_3(%arg0: i32) -> (i32, i32) {
    %c0_i32 = arith.constant 0 : i32
    %c0_i32_0 = arith.constant 0 : i32
    %c0_i32_1 = arith.constant 0 : i32
    return %c0_i32, %c0_i32_0 : i32, i32
  }
  func.func @transform_4(%arg0: i32) -> (i32, i32) {
    %c0_i32 = arith.constant 0 : i32
    %c0_i32_0 = arith.constant 0 : i32
    %c0_i32_1 = arith.constant 0 : i32
    return %c0_i32, %c0_i32_0 : i32, i32
  }
  func.func @transform_5(%arg0: i32) -> (i32, i32) {
    %c0_i32 = arith.constant 0 : i32
    %c0_i32_0 = arith.constant 0 : i32
    %c0_i32_1 = arith.constant 0 : i32
    return %c0_i32, %c0_i32_0 : i32, i32
  }
  func.func @transform_6(%arg0: i32) -> (i32, i32) {
    %c0_i32 = arith.constant 0 : i32
    %c0_i32_0 = arith.constant 0 : i32
    %c0_i32_1 = arith.constant 0 : i32
    return %c0_i32, %c0_i32_0 : i32, i32
  }
  func.func @transform_7(%arg0: i32) -> (i32, i32, i32) {
    %c0_i32 = arith.constant 0 : i32
    %c0_i32_0 = arith.constant 0 : i32
    %c0_i32_1 = arith.constant 0 : i32
    return %arg0, %c0_i32, %c0_i32_0 : i32, i32, i32
  }
}

</mosaic_0001>

<bundles_post_ra>
// kernel: tpu_custom_call.1
= control target key start
LH: loop header
LB: loop body
LE: loop exit
PB: predicated region body
PF: predicated region fallthrough
CT: control target
= control target key end

     0   :  { %v42_v1 = vlaneseq  ;;  %v878_v3 = vmov 0   ;;  %vm31_vm1 = vcmask 64512   ;;  %v879_v12 = vmov 0.0   ;;  %s1310_s0 = inlined_call_operand.vmem [shape: f32[8,8,4], index: 0, kind: input, shape index: {}]   ;;  %s1311_s1 = inlined_call_operand.vmem [shape: s32[8,4], index: 1, kind: input, shape index: {}]   ;;  %s1312_s2 = inlined_call_operand.vmem [shape: f32[8,4], index: 2, kind: input, shape index: {}]   ;;  %s1313_s3 = inlined_call_operand.vmem [shape: f32[8,1], index: 3, kind: input, shape index: {}]   ;;  %s1314_s4 = inlined_call_operand.vmem [shape: f32[8,1], index: 4, kind: input, shape index: {}]   ;;  %s1315_s5 = inlined_call_operand.vmem [shape: f32[8,8], index: 5, kind: input, shape index: {}]   ;;  %s1316_s6 = inlined_call_operand.vmem [shape: f32[8,8], index: 6, kind: input, shape index: {}]   ;;  %s1317_s7 = inlined_call_operand.hbm [shape: f32[1,1,1], index: 7, kind: output, shape index: {}]  }
   0x1   :  { %v27_v0 = vld [vmem:[%s1313_s3] sm:$0xff]  ;;  %810 = vset.pattern.permute.xlu0 %v878_v3  ;;  %811 = vset.pattern.permute.xlu1 %v878_v3  ;;  %v880_v14 = vmov 1.0  }
   0x2   :  { %v812_v2 = vld [vmem:[%s1311_s1] ss:$0 sm:$0xff]  ;;  %v932_v4 = vld [vmem:[%s1312_s2 + $0x1] sm:$0x1]  ;;  %53 = vperm.xlu0 %810, %v27_v0   ;;  %v935_v5 = vshrl.u32 %v42_v1, 7 }
   0x3   :  { %v813_v6 = vld [vmem:[%s1311_s1 + $0x1] ss:$0 sm:$0xff]  ;;  %vm165_vm0 = vcmp.gt.f32.partialorder %v932_v4, 0.0  ;;  %v814_v11 = vld [vmem:[%s1311_s1 + $0x2] ss:$0 sm:$0xff] }
   0x4   :  { %v166_v7 = vsel %vm165_vm0, 1, %v878_v3  ;;  %v29_v8 = vld [vmem:[%s1315_s5] sm:$0xff]  ;;  %vm48_vm2 = vcmp.eq.s32.totalorder %v935_v5, %v812_v2  ;;  %vm81_vm3 = vcmp.eq.s32.totalorder %v935_v5, %v813_v6  ;;  %vm176_vm5 = vcmp.eq.s32.totalorder %v935_v5, %v814_v11 }
   0x5   :  { %v28_v9 = vld [vmem:[%s1314_s4] sm:$0xff]  ;;  %v167_v10 = vperm.slane %v166_v7, 0  ;;  %v954_v13 = vsel %vm48_vm2, 1.0, %v879_v12  ;;  %769 = vmatpush.msk.msra.mxu0 %vm48_vm2, %v880_v14  ;;  %774 = vmatpush.msk.msra.mxu2 %vm81_vm3, %v880_v14  ;;  %v960_v16 = vsel %vm81_vm3, 1.0, %v879_v12 }
   0x6   :  { %701 = vperm.xlu1 %811, %v28_v9   ;;  %v815_v15 = vld [vmem:[%s1311_s1 + $0x3] ss:$0 sm:$0xff]  ;;  %770 = vmatmul.msk.f32.vlgmr.msra.gmra.mxu0 %vm31_vm1, %v29_v8  ;;  %v816_v18 = vld [vmem:[%s1311_s1 + $0x4] ss:$0 sm:$0xff]  ;;  %v982_v20 = vld [vmem:[%s1311_s1 + $0x5] ss:$0 sm:$0xff] }
   0x7   :  { %vm962_vm4 = vcmp.eq.s32.totalorder %v167_v10, 1  ;;  %775 = vmatmul.msk.f32.vlgmr.msra.gmra.mxu2 %vm31_vm1, %v29_v8  ;;  %779 = vmatpush.msk.msrb.mxu0 %vm176_vm5, %v880_v14  ;;  %vm264_vm6 = vcmp.eq.s32.totalorder %v935_v5, %v815_v15  ;;  %vm352_vm7 = vcmp.eq.s32.totalorder %v935_v5, %v816_v18  ;;  %v990_v21 = vld [vmem:[%s1311_s1 + $0x6] ss:$0 sm:$0xff] }
   0x8   :  { %v170_v19 = vsel %vm962_vm4, %v960_v16, %v954_v13  ;;  %784 = vmatpush.msk.msrb.mxu2 %vm264_vm6, %v880_v14 }
   0x9   :  { %12 = vsyncpa [#allocation3], 0  ;;  %789 = vmatpush.msk.msra.mxu0 %vm352_vm7, %v880_v14  ;;  %vm440_vm8 = vcmp.eq.s32.totalorder %v935_v5, %v982_v20  ;;  %vm528_vm9 = vcmp.eq.s32.totalorder %v935_v5, %v990_v21  ;;  %v32_v22 = vsel %vm31_vm1, %v29_v8, -inf  ;;  %v44_v23 = vld [vmem:[%s1310_s0] sm:$0xff]  ;;  %vm58_vm10 = vcmask 31744   ;;  %v1017_v25 = vld [vmem:[%s1310_s0 + $0x8] sm:$0xff] }
   0xa   :  { %794 = vmatpush.msk.msra.mxu2 %vm440_vm8, %v880_v14  ;;  %v66_v24 = vmul.f32 %v954_v13, %v44_v23  ;;  %v84_v27 = vmul.f32 %v960_v16, %v1017_v25  ;;  %v1026_v31 = vld [vmem:[%s1310_s0 + $0x10] sm:$0xff]  ;;  %v1031_v32 = vsel %vm176_vm5, 1.0, %v879_v12  ;;  %v1038_v37 = vld [vmem:[%s1310_s0 + $0x18] sm:$0xff]  ;;  %v1043_v38 = vsel %vm264_vm6, 1.0, %v879_v12  ;;  %v1048_v40 = vld [vmem:[%s1312_s2 + $0x2] sm:$0x1] }
   0xb   :  { %v179_v35 = vmul.f32 %v1031_v32, %v1026_v31  ;;  %v267_v46 = vmul.f32 %v1043_v38, %v1038_v37  ;;  %vm253_vm11 = vcmp.gt.f32.partialorder %v1048_v40, 0.0  ;;  %v1063_v50 = vld [vmem:[%s1312_s2 + $0x3] sm:$0x1]  ;;  %v1069_v54 = vld [vmem:[%s1312_s2 + $0x4] sm:$0x1]  ;;  %v1080_v58 = vsel %vm352_vm7, 1.0, %v879_v12 }
   0xc   :  { %v67_v26 = vsel %vm58_vm10, %v66_v24, 0.0  ;;  %v85_v29 = vsel %vm58_vm10, %v84_v27, 0.0  ;;  %v254_v53 = vsel %vm253_vm11, 1, %v878_v3  ;;  %vm341_vm12 = vcmp.gt.f32.partialorder %v1063_v50, 0.0  ;;  %v1075_v57 = vld [vmem:[%s1310_s0 + $0x20] sm:$0xff]  ;;  %v1140_v20 = vld [vmem:[%s1310_s0 + $0x28] sm:$0xff] }
   0xd   :  { %v68_v28 = vrot.slane %v67_v26, 4  ;;  %v86_v33 = vrot.slane %v85_v29, 4  ;;  %v180_v41 = vsel %vm58_vm10, %v179_v35, 0.0  ;;  %v255_v56 = vperm.slane %v254_v53, 0  ;;  %v1088_v63 = vld [vmem:[%s1312_s2 + $0x5] sm:$0x1] }
   0xe   :  { %780 = vmatmul.msk.f32.vlgmr.msrb.gmra.mxu0 %vm31_vm1, %v29_v8  ;;  %v181_v49 = vrot.slane %v180_v41, 4  ;;  %vm429_vm13 = vcmp.gt.f32.partialorder %v1069_v54, 0.0  ;;  %v268_v61 = vsel %vm58_vm10, %v267_v46, 0.0  ;;  %v342_v62 = vsel %vm341_vm12, 1, %v878_v3  ;;  %v1127_v27 = vld [vmem:[%s1312_s2 + $0x6] sm:$0x1] }
   0xf   :  { %785 = vmatmul.msk.f32.vlgmr.msrb.gmra.mxu2 %vm31_vm1, %v29_v8  ;;  %799 = vmatpush.msk.msrb.mxu0 %vm528_vm9, %v880_v14  ;;  %v69_v30 = vadd.f32 %v68_v28, %v67_v26  ;;  %v87_v36 = vadd.f32 %v86_v33, %v85_v29  ;;  %vm1090_vm14 = vcmp.eq.s32.totalorder %v255_v56, 1  ;;  %v343_v2 = vperm.slane %v342_v62, 0  ;;  %s757_s27 = sshll.u32 %s1317_s7, 4  ;;  %s881_s28 = smov [#allocation2]   ;;  %s758_s27 = int_to_ptr.hbm [resolvable:$true] %s757_s27 }
  0x10   :  { %v182_v0 = vadd.f32 %v181_v49, %v180_v41  ;;  %v430_v6 = vsel %vm429_vm13, 1, %v878_v3  ;;  %v355_v9 = vmul.f32 %v1080_v58, %v1075_v57  ;;  %v258_v14 = vsel %vm1090_vm14, %v1031_v32, %v170_v19  ;;  %s755_s29 = sshll.u32 %s881_s28, 4  ;;  %s756_s29 = int_to_ptr.vmem [resolvable:$true] %s755_s29 }
  0x11   :  { %v70_v34 = vrot.slane %v69_v30, 2  ;;  %v88_v45 = vrot.slane %v87_v36, 2  ;;  %v431_v10 = vperm.slane %v430_v6, 0  ;;  %vm1107_vm15 = vcmp.eq.s32.totalorder %v343_v2, 1 }
  0x12   :  { %vm517_vm0 = vcmp.gt.f32.partialorder %v1088_v63, 0.0  ;;  %v269_v18 = vrot.slane %v268_v61, 4  ;;  %v183_v26 = vrot.slane %v182_v0, 2  ;;  %v346_v28 = vsel %vm1107_vm15, %v1043_v38, %v258_v14 }
  0x13   :  { %v71_v42 = vadd.f32 %v70_v34, %v69_v30  ;;  %v1095_v7 = vadd.f32 %v88_v45, %v87_v36  ;;  %v518_v19 = vsel %vm517_vm0, 1, %v878_v3  ;;  %v356_v30 = vsel %vm58_vm10, %v355_v9, 0.0  ;;  %v819_v34 = vld [vmem:[%s1311_s1 + $0x7] ss:$0 sm:$0xff]  ;;  %v1188_v9 = vld [vmem:[%s1310_s0 + $0x38] sm:$0xff] }
  0x14   :  { %vm1133_vm2 = vcmp.eq.s32.totalorder %v431_v10, 1  ;;  %v270_v41 = vadd.f32 %v269_v18, %v268_v61  ;;  %vm605_vm3 = vcmp.gt.f32.partialorder %v1127_v27, 0.0  ;;  %vm616_vm5 = vcmp.eq.s32.totalorder %v935_v5, %v819_v34 }
  0x15   :  { %v72_v55 = vrot.slane %v71_v42, 1  ;;  %v90_v35 = vrot.slane %v1095_v7, 1  ;;  %v434_v49 = vsel %vm1133_vm2, %v1080_v58, %v346_v28  ;;  %v1182_v2 = vsel %vm528_vm9, 1.0, %v879_v12 }
  0x16   :  { %790 = vmatmul.msk.f32.vlgmr.msra.gmra.mxu0 %vm31_vm1, %v29_v8  ;;  %v271_v62 = vrot.slane %v270_v41, 2  ;;  %v1191_v10 = vsel %vm616_vm5, 1.0, %v879_v12 }
  0x17   :  { %795 = vmatmul.msk.f32.vlgmr.msra.gmra.mxu2 %vm31_vm1, %v29_v8  ;;  %v73_v24 = vadd.f32 %v72_v55, %v71_v42  ;;  %v606_v55 = vsel %vm605_vm3, 1, %v878_v3 }
  0x1e   :  { %800 = vmatmul.msk.f32.vlgmr.msrb.gmra.mxu0 %vm31_vm1, %v29_v8 }
  0x2c   :  { %33 = vmax.xlane.f32.xlu0 %v32_v22 }
  0x74   :  { %v54_v39 = vpop.permute.xlu0 %53 }
  0x75   :  { %v1051_v43 = vadd.f32 %v54_v39, %v44_v23  ;;  %v57_v44 = vmul.f32 %v954_v13, %v54_v39  ;;  %v1115_v23 = vld [vmem:[%s1312_s2] sm:$0x1]  ;;  %v1121_v13 = vsel %vm440_vm8, 1.0, %v879_v12  ;;  %v519_v39 = vperm.slane %v518_v19, 0 }
  0x76   :  { %v74_v45 = vmul.f32 %v73_v24, %v1115_v23 }
  0x77   :  { %v59_v47 = vsel %vm58_vm10, %v57_v44, 0.0  ;;  %v126_v48 = vsel %vm58_vm10, %v1051_v43, -inf  ;;  %v1152_v44 = vld [vmem:[%s1312_s2 + $0x7] sm:$0x1]  ;;  %vm1167_vm6 = vcmp.eq.s32.totalorder %v519_v39, 1 }
  0x78   :  { %v60_v51 = vrot.slane %v59_v47, 4  ;;  %v127_v52 = vrot.slane %v126_v48, 4  ;;  %vm693_vm7 = vcmp.gt.f32.partialorder %v1152_v44, 0.0  ;;  %v522_v5 = vsel %vm1167_vm6, %v1121_v13, %v434_v49 }
  0x7a   :  { %v61_v59 = vadd.f32 %v60_v51, %v59_v47  ;;  %v128_v60 = vmax.f32 %v126_v48, %v127_v52  ;;  %v1155_v47 = vadd.f32 %v183_v26, %v182_v0  ;;  %v357_v48 = vrot.slane %v356_v30, 4 }
  0x7b   :  { %v443_v51 = vmul.f32 %v1121_v13, %v1140_v20 }
  0x7c   :  { %v129_v8 = vrot.slane %v128_v60, 2  ;;  %v62_v11 = vrot.slane %v61_v59, 2  ;;  %v358_v14 = vadd.f32 %v357_v48, %v356_v30 }
  0x7e   :  { %v130_v22 = vmax.f32 %v128_v60, %v129_v8  ;;  %v63_v36 = vadd.f32 %v62_v11, %v61_v59  ;;  %v607_v60 = vperm.slane %v606_v55, 0  ;;  %v444_v8 = vsel %vm58_vm10, %v443_v51, 0.0  ;;  %v1220_v55 = vld [vmem:[%s1316_s6] sm:$0xff] }
  0x7f   :  { %v694_v11 = vsel %vm693_vm7, 1, %v878_v3  ;;  %v272_v3 = vadd.f32 %v271_v62, %v270_v41  ;;  %v445_v28 = vrot.slane %v444_v8, 4  ;;  %v359_v49 = vrot.slane %v358_v14, 2 }
  0x80   :  { %v131_v29 = vrot.slane %v130_v22, 1  ;;  %v64_v56 = vrot.slane %v63_v36, 1  ;;  %vm1197_vm8 = vcmp.eq.s32.totalorder %v607_v60, 1  ;;  %v695_v26 = vperm.slane %v694_v11, 0 }
  0x81   :  { %v610_v39 = vsel %vm1197_vm8, %v1182_v2, %v522_v5  ;;  %v360_v5 = vadd.f32 %v359_v49, %v358_v14 }
  0x82   :  { %v1146_v42 = vmax.f32 %v130_v22, %v131_v29  ;;  %v65_v12 = vadd.f32 %v64_v56, %v63_v36  ;;  %v619_v29 = vmul.f32 %v1191_v10, %v1188_v9  ;;  %vm1209_vm9 = vcmp.eq.s32.totalorder %v695_v26, 1 }
  0x83   :  { %v112_v46 = vpop.f32.mrf.mxu0  ;;  %v91_v36 = vadd.f32 %v90_v35, %v1095_v7  ;;  %v446_v35 = vadd.f32 %v445_v28, %v444_v8 }
  0x84   :  { %v115_v52 = vmul.f32 %v960_v16, %v112_v46  ;;  %v133_v53 = vsub.f32 %v1051_v43, %v1146_v42  ;;  %v1176_v16 = vld [vmem:[%s1310_s0 + $0x30] sm:$0xff]  ;;  %v75_v48 = vadd.f32 %v74_v45, %v65_v12  ;;  %v273_v45 = vrot.slane %v272_v3, 1 }
  0x85   :  { %v531_v24 = vmul.f32 %v1182_v2, %v1176_v16  ;;  %v620_v11 = vsel %vm58_vm10, %v619_v29, 0.0 }
  0x86   :  { %v116_v61 = vsel %vm58_vm10, %v115_v52, 0.0  ;;  %v134_v0 = vmul.f32 1.442695, %v133_v53  ;;  %v185_v52 = vrot.slane %v1155_v47, 1  ;;  %v274_v29 = vadd.f32 %v273_v45, %v272_v3 }
  0x87   :  { %v117_v6 = vrot.slane %v116_v61, 4  ;;  %v532_v56 = vsel %vm58_vm10, %v531_v24, 0.0 }
  0x88   :  { %820 = vpow2.f32 %v134_v0 }
  0x89   :  { %v118_v18 = vadd.f32 %v117_v6, %v116_v61  ;;  %v1227_v61 = vpop.permute.xlu1 %701 }
  0x8a   :  { %v204_v22 = vpop.f32.mrf.mxu2 }
  0x8b   :  { %v207_v19 = vmul.f32 %v1031_v32, %v204_v22  ;;  %v119_v30 = vrot.slane %v118_v18, 2  ;;  %v292_v34 = vpop.f32.mrf.mxu0 }
  0x8c   :  { %v295_v41 = vmul.f32 %v1043_v38, %v292_v34  ;;  %v698_v38 = vsel %vm1209_vm9, %v1191_v10, %v610_v39  ;;  %v621_v34 = vrot.slane %v620_v11, 4 }
  0x8d   :  { %v208_v32 = vsel %vm58_vm10, %v207_v19, 0.0  ;;  %v120_v51 = vadd.f32 %v119_v30, %v118_v18  ;;  %v533_v18 = vrot.slane %v532_v56, 4  ;;  %v704_v12 = vmul.f32 %v1227_v61, %v698_v38 }
  0x8e   :  { %v209_v53 = vrot.slane %v208_v32, 4  ;;  %v821_v60 = vpop.eup %820  ;;  %v296_v7 = vsel %vm58_vm10, %v295_v41, 0.0  ;;  %v186_v19 = vadd.f32 %v185_v52, %v1155_v47  ;;  %v447_v30 = vrot.slane %v446_v35, 2 }
  0x8f   :  { %v121_v62 = vrot.slane %v120_v51, 1  ;;  %v297_v6 = vrot.slane %v296_v7, 4  ;;  %154 = vmatpush.msra.mxu1 %v821_v60  ;;  %v361_v60 = vrot.slane %v360_v5, 1  ;;  %v705_v47 = vsel %vm58_vm10, %v704_v12, 0.0 }
  0x90   :  { %v210_v0 = vadd.f32 %v209_v53, %v208_v32  ;;  %771 = vmatmul.msk.f32.vlgmr.msra.gmra.mxu1 %vm31_vm1, %v1220_v55  ;;  %v448_v52 = vadd.f32 %v447_v30, %v446_v35 }
  0x91   :  { %v122_v22 = vadd.f32 %v121_v62, %v120_v51  ;;  %v298_v8 = vadd.f32 %v297_v6, %v296_v7  ;;  %v534_v51 = vadd.f32 %v533_v18, %v532_v56  ;;  %v622_v6 = vadd.f32 %v621_v34, %v620_v11 }
  0x92   :  { %v211_v24 = vrot.slane %v210_v0, 2  ;;  %v380_v26 = vpop.f32.mrf.mxu2  ;;  %v449_v12 = vrot.slane %v448_v52, 1 }
  0x93   :  { %v383_v28 = vmul.f32 %v1080_v58, %v380_v26  ;;  %v123_v39 = vadd.f32 %v122_v22, %v91_v36  ;;  %v299_v41 = vrot.slane %v298_v8, 2  ;;  %v468_v53 = vpop.f32.mrf.mxu0  ;;  %v706_v26 = vrot.slane %v705_v47, 4 }
  0x94   :  { %v212_v32 = vadd.f32 %v211_v24, %v210_v0  ;;  %v471_v49 = vmul.f32 %v1121_v13, %v468_v53  ;;  %v535_v24 = vrot.slane %v534_v51, 2  ;;  %v362_v53 = vadd.f32 %v361_v60, %v360_v5 }
  0x95   :  { %v384_v14 = vsel %vm58_vm10, %v383_v28, 0.0  ;;  %v300_v62 = vadd.f32 %v299_v41, %v298_v8  ;;  %v124_v36 = vmul.f32 %v123_v39, %v932_v4  ;;  %v623_v30 = vrot.slane %v622_v6, 2 }
  0x96   :  { %v213_v7 = vrot.slane %v212_v32, 1  ;;  %v385_v38 = vrot.slane %v384_v14, 4  ;;  %v472_v58 = vsel %vm58_vm10, %v471_v49, 0.0 }
  0x97   :  { %v301_v45 = vrot.slane %v300_v62, 1  ;;  %v473_v22 = vrot.slane %v472_v58, 4  ;;  %v125_v28 = vadd.f32 %v124_v36, %v75_v48 }
  0x98   :  { %v214_v3 = vadd.f32 %v213_v7, %v212_v32  ;;  %v386_v0 = vadd.f32 %v385_v38, %v384_v14  ;;  %v536_v14 = vadd.f32 %v535_v24, %v534_v51  ;;  %v450_v38 = vadd.f32 %v449_v12, %v448_v52 }
  0x99   :  { %v302_v56 = vadd.f32 %v301_v45, %v300_v62  ;;  %v474_v8 = vadd.f32 %v473_v22, %v472_v58 }
  0x9a   :  { %v215_v13 = vadd.f32 %v214_v3, %v186_v19  ;;  %v387_v18 = vrot.slane %v386_v0, 2  ;;  %v556_v41 = vpop.f32.mrf.mxu2  ;;  %v707_v19 = vadd.f32 %v706_v26, %v705_v47 }
  0x9b   :  { %v559_v35 = vmul.f32 %v1182_v2, %v556_v41  ;;  %v303_v4 = vadd.f32 %v302_v56, %v274_v29  ;;  %v475_v39 = vrot.slane %v474_v8, 2  ;;  %v644_v32 = vpop.f32.mrf.mxu0  ;;  %v624_v2 = vadd.f32 %v623_v30, %v622_v6 }
  0x9c   :  { %v216_v11 = vmul.f32 %v215_v13, %v1048_v40  ;;  %v388_v34 = vadd.f32 %v387_v18, %v386_v0  ;;  %v647_v48 = vmul.f32 %v1191_v10, %v644_v32  ;;  %v537_v0 = vrot.slane %v536_v14, 1 }
  0x9d   :  { %v560_v49 = vsel %vm58_vm10, %v559_v35, 0.0  ;;  %v304_v7 = vmul.f32 %v303_v4, %v1063_v50  ;;  %v476_v5 = vadd.f32 %v475_v39, %v474_v8  ;;  %v708_v22 = vrot.slane %v707_v19, 2 }
  0x9e   :  { %v389_v62 = vrot.slane %v388_v34, 1  ;;  %v561_v60 = vrot.slane %v560_v49, 4  ;;  %v648_v58 = vsel %vm58_vm10, %v647_v48, 0.0  ;;  %v217_v40 = vadd.f32 %v216_v11, %v125_v28 }
  0x9f   :  { %v477_v36 = vrot.slane %v476_v5, 1  ;;  %v649_v45 = vrot.slane %v648_v58, 4  ;;  %v34_v51 = vpop.xlane.xlu0 %33  ;;  %v625_v56 = vrot.slane %v624_v2, 1  ;;  %v538_v41 = vadd.f32 %v537_v0, %v536_v14 }
  0xa0   :  { %v390_v29 = vadd.f32 %v389_v62, %v388_v34  ;;  %v562_v3 = vadd.f32 %v561_v60, %v560_v49  ;;  %v35_v24 = vrot.slane %v34_v51, 4  ;;  %v305_v10 = vadd.f32 %v304_v7, %v217_v40 }
  0xa1   :  { %v478_v26 = vadd.f32 %v477_v36, %v476_v5  ;;  %v650_v13 = vadd.f32 %v649_v45, %v648_v58  ;;  %v709_v12 = vadd.f32 %v708_v22, %v707_v19  ;;  %v626_v32 = vadd.f32 %v625_v56, %v624_v2 }
  0xa2   :  { %v391_v47 = vadd.f32 %v390_v29, %v362_v53  ;;  %v563_v50 = vrot.slane %v562_v3, 2  ;;  %v36_v18 = vmax.f32 %v34_v51, %v35_v24 }
  0xa3   :  { %v479_v6 = vadd.f32 %v478_v26, %v450_v38  ;;  %v651_v28 = vrot.slane %v650_v13, 2 }
  0xa4   :  { %v392_v52 = vmul.f32 %v391_v47, %v1069_v54  ;;  %v564_v8 = vadd.f32 %v563_v50, %v562_v3  ;;  %v37_v35 = vrot.slane %v36_v18, 2  ;;  %v710_v54 = vrot.slane %v709_v12, 1 }
  0xa5   :  { %v480_v30 = vmul.f32 %v479_v6, %v1088_v63  ;;  %v652_v4 = vadd.f32 %v651_v28, %v650_v13 }
  0xa6   :  { %v565_v11 = vrot.slane %v564_v8, 1  ;;  %v393_v34 = vadd.f32 %v392_v52, %v305_v10  ;;  %v38_v39 = vmax.f32 %v36_v18, %v37_v35  ;;  %v711_v58 = vadd.f32 %v710_v54, %v709_v12 }
  0xa7   :  { %v653_v49 = vrot.slane %v652_v4, 1 }
  0xa8   :  { %v566_v53 = vadd.f32 %v565_v11, %v564_v8  ;;  %v481_v48 = vadd.f32 %v480_v30, %v393_v34  ;;  %v39_v7 = vrot.slane %v38_v39, 1 }
  0xa9   :  { %v654_v5 = vadd.f32 %v653_v49, %v652_v4 }
  0xaa   :  { %v567_v62 = vadd.f32 %v566_v53, %v538_v41  ;;  %v40_v60 = vmax.f32 %v38_v39, %v39_v7 }
  0xab   :  { %v655_v38 = vadd.f32 %v654_v5, %v626_v32 }
  0xac   :  { %v568_v14 = vmul.f32 %v567_v62, %v1127_v27  ;;  %802 = vpush %v40_v60 }
  0xad   :  { %v656_v19 = vmul.f32 %v655_v38, %v1152_v44 }
  0xae   :  { %v569_v63 = vadd.f32 %v568_v14, %v481_v48 }
  0xb0   :  { %v657_v40 = vadd.f32 %v656_v19, %v569_v63 }
  0xb2   :  { %v1250_v29 = vadd.f32 %v711_v58, %v657_v40 }
  0xdd   :  { %s803_s6 = spop %802 }
  0xde   :  { %v1253_v51 = vstv %s803_s6 }
 0x10d   :  { %v156_v36 = vpop.f32.mrf.mxu1 }
 0x10e   :  { %822 = vlog2.f32 %v156_v36 }
 0x114   :  { %v823_v2 = vpop.eup %822 }
 0x115   :  { %v160_v3 = vmul.f32 0.6931472, %v823_v2 }
 0x117   :  { %v161_v45 = vadd.f32 %v160_v3, %v1146_v42 }
 0x119   :  { %v163_v0 = vadd.f32 %v1253_v51, %v161_v45 }
 0x11b   :  { %v164_v27 = vadd.f32 %v1017_v25, %v163_v0 }
 0x11d   :  { %v169_v44 = vsel %vm962_vm4, %v164_v27, %v1051_v43  ;;  %vm748_vm4 = vcmask 0  }
 0x11e   :  { %v218_v22 = vsel %vm58_vm10, %v169_v44, -inf }
 0x11f   :  { %v219_v24 = vrot.slane %v218_v22, 4 }
 0x121   :  { %v220_v10 = vmax.f32 %v218_v22, %v219_v24 }
 0x123   :  { %v221_v47 = vrot.slane %v220_v10, 2 }
 0x125   :  { %v222_v26 = vmax.f32 %v220_v10, %v221_v47 }
 0x127   :  { %v223_v50 = vrot.slane %v222_v26, 1 }
 0x129   :  { %v224_v13 = vmax.f32 %v222_v26, %v223_v50 }
 0x12b   :  { %v225_v56 = vsub.f32 %v169_v44, %v224_v13 }
 0x12d   :  { %v226_v42 = vmul.f32 1.442695, %v225_v56 }
 0x12f   :  { %824 = vpow2.f32 %v226_v42 }
 0x135   :  { %v825_v18 = vpop.eup %824 }
 0x136   :  { %243 = vmatpush.msra.mxu3 %v825_v18 }
 0x137   :  { %776 = vmatmul.msk.f32.vlgmr.msra.gmra.mxu3 %vm31_vm1, %v1220_v55 }
 0x1ba   :  { %v245_v25 = vpop.f32.mrf.mxu3 }
 0x1bb   :  { %826 = vlog2.f32 %v245_v25 }
 0x1c1   :  { %v827_v17 = vpop.eup %826 }
 0x1c2   :  { %v249_v43 = vmul.f32 0.6931472, %v827_v17 }
 0x1c4   :  { %v250_v52 = vadd.f32 %v249_v43, %v224_v13 }
 0x1c6   :  { %v251_v6 = vadd.f32 %v250_v52, %v1253_v51 }
 0x1c8   :  { %v252_v8 = vadd.f32 %v1026_v31, %v251_v6 }
 0x1ca   :  { %v257_v28 = vsel %vm1090_vm14, %v252_v8, %v169_v44 }
 0x1cb   :  { %v306_v41 = vsel %vm58_vm10, %v257_v28, -inf }
 0x1cc   :  { %v307_v12 = vrot.slane %v306_v41, 4 }
 0x1ce   :  { %v308_v35 = vmax.f32 %v306_v41, %v307_v12 }
 0x1d0   :  { %v309_v30 = vrot.slane %v308_v35, 2 }
 0x1d2   :  { %v310_v11 = vmax.f32 %v308_v35, %v309_v30 }
 0x1d4   :  { %v311_v4 = vrot.slane %v310_v11, 1 }
 0x1d6   :  { %v312_v34 = vmax.f32 %v310_v11, %v311_v4 }
 0x1d8   :  { %v313_v39 = vsub.f32 %v257_v28, %v312_v34 }
 0x1da   :  { %v314_v53 = vmul.f32 1.442695, %v313_v39 }
 0x1dc   :  { %828 = vpow2.f32 %v314_v53 }
 0x1e2   :  { %v829_v32 = vpop.eup %828 }
 0x1e3   :  { %331 = vmatpush.msrb.mxu1 %v829_v32 }
 0x1e4   :  { %781 = vmatmul.msk.f32.vlgmr.msrb.gmra.mxu1 %vm31_vm1, %v1220_v55 }
 0x261   :  { %v333_v31 = vpop.f32.mrf.mxu1 }
 0x262   :  { %830 = vlog2.f32 %v333_v31 }
 0x268   :  { %v831_v1 = vpop.eup %830 }
 0x269   :  { %v337_v49 = vmul.f32 0.6931472, %v831_v1 }
 0x26b   :  { %v338_v48 = vadd.f32 %v337_v49, %v312_v34 }
 0x26d   :  { %v339_v7 = vadd.f32 %v338_v48, %v1253_v51 }
 0x26f   :  { %v340_v62 = vadd.f32 %v1038_v37, %v339_v7 }
 0x271   :  { %v345_v5 = vsel %vm1107_vm15, %v340_v62, %v257_v28 }
 0x272   :  { %v394_v54 = vsel %vm58_vm10, %v345_v5, -inf }
 0x273   :  { %v395_v60 = vrot.slane %v394_v54, 4 }
 0x275   :  { %v396_v38 = vmax.f32 %v394_v54, %v395_v60 }
 0x277   :  { %v397_v14 = vrot.slane %v396_v38, 2 }
 0x279   :  { %v398_v19 = vmax.f32 %v396_v38, %v397_v14 }
 0x27b   :  { %v399_v63 = vrot.slane %v398_v19, 1 }
 0x27d   :  { %v400_v58 = vmax.f32 %v398_v19, %v399_v63 }
 0x27f   :  { %v401_v40 = vsub.f32 %v345_v5, %v400_v58 }
 0x281   :  { %v402_v36 = vmul.f32 1.442695, %v401_v40 }
 0x283   :  { %832 = vpow2.f32 %v402_v36 }
 0x289   :  { %v833_v2 = vpop.eup %832 }
 0x28a   :  { %419 = vmatpush.msrb.mxu3 %v833_v2 }
 0x28b   :  { %786 = vmatmul.msk.f32.vlgmr.msrb.gmra.mxu3 %vm31_vm1, %v1220_v55 }
 0x30e   :  { %v421_v37 = vpop.f32.mrf.mxu3 }
 0x30f   :  { %834 = vlog2.f32 %v421_v37 }
 0x315   :  { %v835_v15 = vpop.eup %834 }
 0x316   :  { %v425_v3 = vmul.f32 0.6931472, %v835_v15 }
 0x318   :  { %v426_v45 = vadd.f32 %v425_v3, %v400_v58 }
 0x31a   :  { %v427_v0 = vadd.f32 %v426_v45, %v1253_v51 }
 0x31c   :  { %v428_v27 = vadd.f32 %v1075_v57, %v427_v0 }
 0x31e   :  { %v433_v44 = vsel %vm1133_vm2, %v428_v27, %v345_v5 }
 0x31f   :  { %v482_v22 = vsel %vm58_vm10, %v433_v44, -inf }
 0x320   :  { %v483_v24 = vrot.slane %v482_v22, 4 }
 0x322   :  { %v484_v10 = vmax.f32 %v482_v22, %v483_v24 }
 0x324   :  { %v485_v47 = vrot.slane %v484_v10, 2 }
 0x326   :  { %v486_v26 = vmax.f32 %v484_v10, %v485_v47 }
 0x328   :  { %v487_v50 = vrot.slane %v486_v26, 1 }
 0x32a   :  { %v488_v13 = vmax.f32 %v486_v26, %v487_v50 }
 0x32c   :  { %v489_v56 = vsub.f32 %v433_v44, %v488_v13 }
 0x32e   :  { %v490_v42 = vmul.f32 1.442695, %v489_v56 }
 0x330   :  { %836 = vpow2.f32 %v490_v42 }
 0x336   :  { %v837_v18 = vpop.eup %836 }
 0x337   :  { %507 = vmatpush.msra.mxu1 %v837_v18 }
 0x338   :  { %791 = vmatmul.msk.f32.vlgmr.msra.gmra.mxu1 %vm31_vm1, %v1220_v55 }
 0x3b5   :  { %v509_v57 = vpop.f32.mrf.mxu1 }
 0x3b6   :  { %838 = vlog2.f32 %v509_v57 }
 0x3bc   :  { %v839_v33 = vpop.eup %838 }
 0x3bd   :  { %v513_v25 = vmul.f32 0.6931472, %v839_v33 }
 0x3bf   :  { %v514_v17 = vadd.f32 %v513_v25, %v488_v13 }
 0x3c1   :  { %v515_v43 = vadd.f32 %v514_v17, %v1253_v51 }
 0x3c3   :  { %v516_v52 = vadd.f32 %v1140_v20, %v515_v43 }
 0x3c5   :  { %v521_v6 = vsel %vm1167_vm6, %v516_v52, %v433_v44 }
 0x3c6   :  { %v570_v8 = vsel %vm58_vm10, %v521_v6, -inf }
 0x3c7   :  { %v571_v28 = vrot.slane %v570_v8, 4 }
 0x3c9   :  { %v572_v41 = vmax.f32 %v570_v8, %v571_v28 }
 0x3cb   :  { %v573_v12 = vrot.slane %v572_v41, 2 }
 0x3cd   :  { %v574_v35 = vmax.f32 %v572_v41, %v573_v12 }
 0x3cf   :  { %v575_v30 = vrot.slane %v574_v35, 1 }
 0x3d1   :  { %v576_v11 = vmax.f32 %v574_v35, %v575_v30 }
 0x3d3   :  { %v577_v4 = vsub.f32 %v521_v6, %v576_v11 }
 0x3d5   :  { %v578_v34 = vmul.f32 1.442695, %v577_v4 }
 0x3d7   :  { %840 = vpow2.f32 %v578_v34 }
 0x3dd   :  { %v841_v39 = vpop.eup %840 }
 0x3de   :  { %595 = vmatpush.msra.mxu3 %v841_v39 }
 0x3df   :  { %796 = vmatmul.msk.f32.vlgmr.msra.gmra.mxu3 %vm31_vm1, %v1220_v55 }
 0x462   :  { %v597_v20 = vpop.f32.mrf.mxu3 }
 0x463   :  { %842 = vlog2.f32 %v597_v20 }
 0x469   :  { %v843_v59 = vpop.eup %842 }
 0x46a   :  { %v601_v53 = vmul.f32 0.6931472, %v843_v59 }
 0x46c   :  { %v602_v32 = vadd.f32 %v601_v53, %v576_v11 }
 0x46e   :  { %v603_v31 = vadd.f32 %v602_v32, %v1253_v51 }
 0x470   :  { %v604_v1 = vadd.f32 %v1176_v16, %v603_v31 }
 0x472   :  { %v609_v49 = vsel %vm1197_vm8, %v604_v1, %v521_v6 }
 0x473   :  { %v658_v48 = vsel %vm58_vm10, %v609_v49, -inf }
 0x474   :  { %v659_v7 = vrot.slane %v658_v48, 4 }
 0x476   :  { %v660_v62 = vmax.f32 %v658_v48, %v659_v7 }
 0x478   :  { %v661_v5 = vrot.slane %v660_v62, 2 }
 0x47a   :  { %v662_v54 = vmax.f32 %v660_v62, %v661_v5 }
 0x47c   :  { %v663_v60 = vrot.slane %v662_v54, 1 }
 0x47e   :  { %v664_v38 = vmax.f32 %v662_v54, %v663_v60 }
 0x480   :  { %v665_v14 = vsub.f32 %v609_v49, %v664_v38 }
 0x482   :  { %v666_v19 = vmul.f32 1.442695, %v665_v14 }
 0x484   :  { %844 = vpow2.f32 %v666_v19 }
 0x48a   :  { %v845_v63 = vpop.eup %844 }
 0x48b   :  { %683 = vmatpush.msrb.mxu1 %v845_v63 }
 0x48c   :  { %801 = vmatmul.msk.f32.vlgmr.msrb.gmra.mxu1 %vm31_vm1, %v1220_v55  ;;  %vm736_vm1 = vcmask 24576  }
 0x509   :  { %v685_v16 = vpop.f32.mrf.mxu1 }
 0x50a   :  { %846 = vlog2.f32 %v685_v16 }
 0x510   :  { %v847_v21 = vpop.eup %846 }
 0x511   :  { %v689_v58 = vmul.f32 0.6931472, %v847_v21 }
 0x513   :  { %v690_v40 = vadd.f32 %v689_v58, %v664_v38 }
 0x515   :  { %v691_v36 = vadd.f32 %v690_v40, %v1253_v51 }
 0x517   :  { %v692_v2 = vadd.f32 %v1188_v9, %v691_v36 }
 0x519   :  { %v697_v37 = vsel %vm1209_vm9, %v692_v2, %v609_v49 }
 0x51a   :  { %v713_v15 = vadd.f32 %v1227_v61, %v697_v37 }
 0x51c   :  { %v714_v3 = vsel %vm58_vm10, %v713_v15, -inf }
 0x51d   :  { %v715_v45 = vrot.slane %v714_v3, 4 }
 0x51f   :  { %v716_v0 = vmax.f32 %v714_v3, %v715_v45 }
 0x521   :  { %v717_v27 = vrot.slane %v716_v0, 2 }
 0x523   :  { %v718_v55 = vmax.f32 %v716_v0, %v717_v27 }
 0x525   :  { %v719_v44 = vrot.slane %v718_v55, 1 }
 0x527   :  { %v720_v22 = vmax.f32 %v718_v55, %v719_v44 }
 0x529   :  { %v721_v24 = vsub.f32 %v713_v15, %v720_v22 }
 0x52b   :  { %v722_v10 = vmul.f32 1.442695, %v721_v24 }
 0x52d   :  { %848 = vpow2.f32 %v722_v10 }
 0x533   :  { %v849_v47 = vpop.eup %848 }
 0x534   :  { %v724_v51 = vsel %vm58_vm10, %v849_v47, 0.0 }
 0x535   :  { %v725_v9 = vrot.slane %v724_v51, 4 }
 0x537   :  { %v726_v26 = vadd.f32 %v725_v9, %v724_v51 }
 0x539   :  { %v727_v46 = vrot.slane %v726_v26, 2 }
 0x53b   :  { %v728_v50 = vadd.f32 %v727_v46, %v726_v26 }
 0x53d   :  { %v729_v13 = vrot.slane %v728_v50, 1 }
 0x53f   :  { %v730_v61 = vadd.f32 %v729_v13, %v728_v50 }
 0x541   :  { %850 = vlog2.f32 %v730_v61 }
 0x547   :  { %v851_v56 = vpop.eup %850 }
 0x548   :  { %v732_v42 = vmul.f32 0.6931472, %v851_v56 }
 0x54a   :  { %v733_v18 = vadd.f32 %v732_v42, %v720_v22 }
 0x54c   :  { %v734_v57 = vsub.f32 %v1250_v29, %v733_v18 }
 0x54e   :  { %v735_v33 = vmul.f32 %v734_v57, %v1115_v23 }
 0x550   :  { %v737_v25 = vsel %vm736_vm1, %v735_v33, 0.0 }
 0x551   :  { %738 = vadd.xlane.f32.xlu1 %v737_v25 }
 0x5c4   :  { %v739_v17 = vpop.xlane.xlu1 %738 }
 0x5c5   :  { %v740_v43 = vrot.slane %v739_v17, 4 }
 0x5c7   :  { %v741_v52 = vadd.f32 %v740_v43, %v739_v17 }
 0x5c9   :  { %v742_v6 = vrot.slane %v741_v52, 2 }
 0x5cb   :  { %v743_v8 = vadd.f32 %v742_v6, %v741_v52 }
 0x5cd   :  { %v744_v28 = vrot.slane %v743_v8, 1 }
 0x5cf   :  { %v745_v41 = vadd.f32 %v744_v28, %v743_v8 }
 0x5d1   :  { %804 = vpush %v745_v41 }
 0x602   :  { %s805_s30 = spop %804 }
 0x603   :  { %v747_v23 = vstv %s805_s30 }
 0x604   :  { %749 = vst.msk [vmem:[#allocation2] sm:$0x1] %vm748_vm4, %v747_v23 }
 0x605   :  { %760 = dma.vmem_to_hbm [thread:$0]  %s756_s29, 16, %s758_s27, [#allocation3]  }
 0x606   :  { %876 = dma.done.wait [#allocation3], 16  }
 0x607   :  { %877 = vsyncadd [#allocation3], 4294967280 }
 0x608   :  { %765 = vsyncpa [#allocation3], 1 }

</bundles_post_ra>
